<compile_context>
chip_gen: v5e
topology: v5e:2x2
jax: 0.10.0
libtpu: 0.0.40
codegen_flags: <defaults>
</compile_context>

<pallas_src>
import jax
import jax.numpy as jnp
from jax.experimental import pallas as pl
from jax.experimental.pallas import tpu as pltpu

_LANE = 128
_TARGET_BLOCK_BYTES = 4 * 1024 * 1024  # ~4 MiB/block; 4 buffers ~= 16 MiB VMEM.


def _copy_kernel(x_ref, o_ref):
    # Identity copy of the current lane-dense (tile_rows, lane) block.
    o_ref[...] = x_ref[...]


def _sublane_multiple(dtype) -> int:
    # Minimum sublane tiling: (8,128) for 4-byte, (16,128) for 2-byte,
    # (32,128) for 1-byte dtypes.
    itemsize = jnp.dtype(dtype).itemsize
    if itemsize >= 4:
        return 8
    return 8 * (4 // itemsize)


def flatten_forward(x: jax.Array, out_features: int) -> jax.Array:
    """Equivalent of the PyTorch Flatten module: x.view(-1, out_features)."""
    total = 1
    for d in x.shape:
        total *= d
    assert total % out_features == 0, (
        f"total elements {total} not divisible by out_features {out_features}")
    out_rows = total // out_features
    out_shape = (out_rows, out_features)

    dtype = x.dtype
    itemsize = jnp.dtype(dtype).itemsize
    sub = _sublane_multiple(dtype)

    # ---- Lane-dense slab path (covers any total that is (sub*128)-aligned).
    if total % (sub * _LANE) == 0:
        # Widest lane count (<= 2048) that keeps rows a multiple of the
        # sublane tile; 128 always works because total % (sub*128) == 0.
        lane = _LANE
        for cand in (2048, 1024, 512, 256):
            if total % cand == 0 and (total // cand) % sub == 0:
                lane = cand
                break
        rows = total // lane

        # Row tile sized by byte budget (double-buffered in + out).
        budget_rows = max(sub, _TARGET_BLOCK_BYTES // (lane * itemsize))
        tile = min(rows, (budget_rows // sub) * sub)
        while rows % tile != 0:
            tile -= sub  # terminates at `sub` since rows % sub == 0

        x2d = jnp.reshape(x, (rows, lane))  # metadata-only
        grid = (rows // tile,)

        out = pl.pallas_call(
            _copy_kernel,
            out_shape=jax.ShapeDtypeStruct((rows, lane), dtype),
            grid_spec=pltpu.PrefetchScalarGridSpec(
                num_scalar_prefetch=0,
                grid=grid,
                in_specs=[pl.BlockSpec((tile, lane), lambda i: (i, 0))],
                out_specs=pl.BlockSpec((tile, lane), lambda i: (i, 0)),
            ),
            input_output_aliases={0: 0},
            compiler_params=pltpu.CompilerParams(
                dimension_semantics=("parallel",),
                vmem_limit_bytes=32 * 1024 * 1024,
            ),
        )(x2d)
        return jnp.reshape(out, out_shape)  # metadata-only

    # ---- Fallback for awkward element counts (total not (sub*128)-aligned).
    # Only reachable for tiny/odd shapes; single full-extent block is legal.
    # TODO(synk): tile this path too if such shapes ever become large.
    x2d = jnp.reshape(x, out_shape)
    return pl.pallas_call(
        _copy_kernel,
        out_shape=jax.ShapeDtypeStruct(out_shape, dtype),
        grid_spec=pltpu.PrefetchScalarGridSpec(
            num_scalar_prefetch=0,
            grid=(1,),
            in_specs=[pl.BlockSpec(out_shape, lambda i: (0, 0))],
            out_specs=pl.BlockSpec(out_shape, lambda i: (0, 0)),
        ),
        input_output_aliases={0: 0},
        compiler_params=pltpu.CompilerParams(
            dimension_semantics=("arbitrary",),
        ),
    )(x2d)


if __name__ == "__main__":
    key = jax.random.PRNGKey(0)
    # Small NCHW input: batch=2, channels=4, spatial=16x16.
    N, C, H, W = 2, 4, 16, 16
    out_features = 64  # Flatten(out_features=64) -> output shape (32, 64)

    x = jax.random.normal(key, (N, C, H, W), dtype=jnp.float32)

    # Reference (same semantics as torch .view on contiguous row-major input).
    y_ref = jnp.reshape(x, (-1, out_features))

    y = flatten_forward(x, out_features)
    y = jax.block_until_ready(y)

    assert y.shape == (N * C * H * W // out_features, out_features)
    assert jnp.array_equal(y, y_ref)

    print("KERNEL_OK")
</pallas_src>

<mosaic_0001>
module attributes {stable_mosaic.version = 11 : i64} {
  func.func @_copy_kernel(%arg0: i32, %arg1: memref<8x256xf32, #tpu.memory_space<vmem>>, %arg2: memref<8x256xf32, #tpu.memory_space<vmem>>) attributes {dimension_semantics = [#tpu.dimension_semantics<parallel>], iteration_bounds = array<i64: 1>, scalar_prefetch = 0 : i64, scratch_operands = 0 : i64, tpu.core_type = #tpu.core_type<tc>, window_params = [{transform_indices = @transform_0, window_bounds = array<i64: 8, 256>}, {transform_indices = @transform_1, window_bounds = array<i64: 8, 256>}]} {
    %c0 = arith.constant 0 : index
    %c0_0 = arith.constant 0 : index
    %0 = vector.load %arg1[%c0, %c0_0] : memref<8x256xf32, #tpu.memory_space<vmem>>, vector<8x256xf32>
    %c0_1 = arith.constant 0 : index
    %c0_2 = arith.constant 0 : index
    %1 = vector.load %arg2[%c0_1, %c0_2] : memref<8x256xf32, #tpu.memory_space<vmem>>, vector<8x256xf32>
    tpu.vector_store %arg2[%c0_1, %c0_2], %0 {strides = array<i32>} : memref<8x256xf32, #tpu.memory_space<vmem>>, vector<8x256xf32>,
    return
  }
  func.func @transform_0(%arg0: i32) -> (i32, i32) {
    %c0_i32 = arith.constant 0 : i32
    %c0_i32_0 = arith.constant 0 : i32
    return %arg0, %c0_i32 : i32, i32
  }
  func.func @transform_1(%arg0: i32) -> (i32, i32) {
    %c0_i32 = arith.constant 0 : i32
    %c0_i32_0 = arith.constant 0 : i32
    return %arg0, %c0_i32 : i32, i32
  }
}

</mosaic_0001>

<bundles_post_ra>
// kernel: tpu_custom_call.1
= control target key start
LH: loop header
LB: loop body
LE: loop exit
PB: predicated region body
PF: predicated region fallthrough
CT: control target
= control target key end

     0   :  { %6 = vsyncpa [#allocation3], 0  ;;  %s116_s0 = inlined_call_operand.hbm [shape: f32[8,256], index: 0, kind: input, shape index: {}, may-alias: {0,1}]   ;;  %s117_s1 = inlined_call_operand.hbm [shape: f32[8,256], index: 1, kind: output, shape index: {}, may-alias: {0,1}]  }
   0x1   :  { %7 = vsyncpa [#allocation4], 0  ;;  %s13_s8 = sshll.u32 %s116_s0, 4  ;;  %s98_s9 = smov [#allocation2]   ;;  %s14_s8 = int_to_ptr.hbm [resolvable:$true] %s13_s8 }
   0x2   :  { %s15_s10 = sshll.u32 %s98_s9, 4  ;;  %s16_s10 = int_to_ptr.vmem [resolvable:$true] %s15_s10 }
   0x3   :  { %18 = dma.hbm_to_vmem [thread:$0]  %s14_s8, 256, %s16_s10, [#allocation3]  }
   0x4   :  { %94 = dma.done.wait [#allocation3], 256  }
   0x5   :  { %95 = vsyncadd [#allocation3], 4294967040  ;;  %s99_s11 = smov [#allocation5]   ;;  %s34_s15 = sshll.u32 %s117_s1, 4  ;;  %v23_v0 = vld [vmem:[#allocation2] sm:$0xff]  ;;  %v24_v1 = vld [vmem:[#allocation2 + $0x8] sm:$0xff]  ;;  %s35_s15 = int_to_ptr.hbm [resolvable:$true] %s34_s15 }
   0x6   :  { %s32_s12 = sshll.u32 %s99_s11, 4  ;;  %25 = vst [vmem:[#allocation5] sm:$0xff] %v23_v0  ;;  %s33_s12 = int_to_ptr.vmem [resolvable:$true] %s32_s12 }
   0x7   :  { %26 = vst [vmem:[#allocation5 + $0x8] sm:$0xff] %v24_v1 }
   0x8   :  { %37 = dma.vmem_to_hbm [thread:$0]  %s33_s12, 256, %s35_s15, [#allocation4]  }
   0x9   :  { %96 = dma.done.wait [#allocation4], 256  }
   0xa   :  { %97 = vsyncadd [#allocation4], 4294967040 }
   0xb   :  { %42 = vsyncpa [#allocation3], 1 }
   0xc   :  { %43 = vsyncpa [#allocation4], 1 }

</bundles_post_ra>
